<compile_context>
chip_gen: v5e
topology: v5e:2x2
jax: 0.10.0
libtpu: 0.0.40
codegen_flags: <defaults>
</compile_context>

<pallas_src>
import jax
import jax.numpy as jnp
from jax.experimental import pallas as pl
from jax.experimental.pallas import tpu as pltpu

_LANES = 128
_SUBLANES = 8
_MAX_TM = 4096   # rows per tile: 4096*128*4B = 2 MiB per f32 input tile
_CHUNK = 64      # rows per in-register streaming chunk (8 vregs per f32 temp)


def _make_kernel(tm, num_tiles, tiles_per_core, total, needs_mask):
    """Build the accumulation kernel for (tm, 128) input tiles."""
    full_rows = total // _LANES        # rows that are completely valid
    col_rem = total % _LANES           # valid lanes in the boundary row (if any)
    has_phantom = (2 * tiles_per_core != num_tiles)
    n_full = tm // _CHUNK
    rem_rows = tm - n_full * _CHUNK    # multiple of 8 by construction

    def kernel(x_ref, t_ref, acc_ref):
        p = pl.program_id(0)           # TensorCore slot ("parallel" axis)
        i = pl.program_id(1)           # row-tile index within the core's slice
        g = p * tiles_per_core + i     # global row-tile index

        @pl.when(i == 0)
        def _():
            acc_ref[...] = jnp.zeros_like(acc_ref)

        def chunk_sums(row0, nrows, masked):
            """(nrows,128) chunk -> four (8,128) partial sums, kept in vregs."""
            x = x_ref[pl.ds(row0, nrows), :].astype(jnp.float32)
            t = t_ref[pl.ds(row0, nrows), :].astype(jnp.float32)

            # Shared exponential for sigmoid and the stable BCE-with-logits term.
            e = jnp.exp(-jnp.abs(x))              # single EUP exp per element
            d = 1.0 + e
            r = pl.reciprocal(d, approx=True)
            r = r * (2.0 - d * r)                 # one Newton step (VPU) -> ~f32 1/d
            prob = jnp.where(x >= 0.0, r, e * r)  # == sigmoid(x)
            # Stable BCE-with-logits (pos_weight == 1):
            #   max(x,0) - x*t + log(1 + exp(-|x|))   (reuses d = 1 + e)
            bce = jnp.maximum(x, 0.0) - x * t + jnp.log(d)
            pt = prob * t

            if masked:
                # Only the last global tile pays this.  Row-threshold compare
                # (overflow-free), plus a lane compare only for the boundary row.
                grow = (jax.lax.broadcasted_iota(jnp.int32, (nrows, _LANES), 0)
                        + g * tm + row0)
                valid = grow < full_rows
                if col_rem:
                    cols = jax.lax.broadcasted_iota(jnp.int32, (nrows, _LANES), 1)
                    valid = valid | ((grow == full_rows) & (cols < col_rem))
                zero = jnp.zeros_like(pt)
                pt = jnp.where(valid, pt, zero)
                prob = jnp.where(valid, prob, zero)
                t = jnp.where(valid, t, zero)
                bce = jnp.where(valid, bce, zero)

            def fold(v):
                # (nrows,128) -> (8,128) by summing whole vregs (VPU, no XLU).
                return v.reshape(nrows // _SUBLANES, _SUBLANES, _LANES).sum(axis=0)

            return fold(pt), fold(prob), fold(t), fold(bce)

        def accumulate(masked):
            carry = tuple(jnp.zeros((_SUBLANES, _LANES), jnp.float32)
                          for _ in range(4))
            if n_full == 1:
                s = chunk_sums(0, _CHUNK, masked)
                carry = tuple(a + b for a, b in zip(carry, s))
            elif n_full > 1:
                def body(c, acc):
                    row0 = pl.multiple_of(c * _CHUNK, _CHUNK)
                    s = chunk_sums(row0, _CHUNK, masked)
                    return tuple(a + b for a, b in zip(acc, s))
                carry = jax.lax.fori_loop(0, n_full, body, carry, unroll=2)
            if rem_rows:
                s = chunk_sums(n_full * _CHUNK, rem_rows, masked)
                carry = tuple(a + b for a, b in zip(carry, s))
            # Single touch of the VMEM accumulator per tile.
            for k in range(4):
                acc_ref[0, k] += carry[k]   # 0: sum p*t, 1: sum p, 2: sum t, 3: sum bce

        if needs_mask:
            @pl.when(g < num_tiles - 1)
            def _():
                accumulate(False)

            @pl.when(g == num_tiles - 1)
            def _():
                accumulate(True)
        elif has_phantom:
            @pl.when(g < num_tiles)
            def _():
                accumulate(False)
        else:
            accumulate(False)

    return kernel


def bce_dice_loss(prediction, targets, d_weight=0.5, smooth=1e-8):
    """Pallas-TPU implementation of BCE_DiceLoss.forward (scalar f32 output)."""
    assert prediction.shape == targets.shape
    total = prediction.size

    x = prediction.reshape(-1)   # native dtype; cast to f32 happens in-kernel
    t = targets.reshape(-1)

    # Lane-dense (rows, 128) view.  This is a free reshape whenever
    # total % 128 == 0 (the common case); otherwise only the <128-element
    # remainder (plus up to 8 rows for very small inputs) is padded.
    # TODO(synk): a flat 1-D BlockSpec + in-kernel tail mask would also remove
    # the full-array copy that jnp.pad implies for the total % 128 != 0 case.
    padded_rows = max(_SUBLANES, pl.cdiv(total, _LANES))
    padded_total = padded_rows * _LANES
    if padded_total != total:
        x = jnp.pad(x, (0, padded_total - total))
        t = jnp.pad(t, (0, padded_total - total))
    m_rows = padded_rows

    x2 = x.reshape(m_rows, _LANES)
    t2 = t.reshape(m_rows, _LANES)

    tm = min(_MAX_TM, (m_rows // _SUBLANES) * _SUBLANES)   # multiple of 8, <= m_rows
    num_tiles = pl.cdiv(m_rows, tm)
    tiles_per_core = pl.cdiv(num_tiles, 2)                 # leading "parallel" axis
    needs_mask = (num_tiles * tm * _LANES != total)

    if num_tiles > 1:
        def in_map(p, i):
            # Clamp so the phantom tile of an odd tile count stays in bounds;
            # its contribution is skipped inside the kernel.
            return (jnp.minimum(p * tiles_per_core + i, num_tiles - 1), 0)
    else:
        def in_map(p, i):
            return (0, 0)

    sums = pl.pallas_call(
        _make_kernel(tm, num_tiles, tiles_per_core, total, needs_mask),
        out_shape=jax.ShapeDtypeStruct((2, 4, _SUBLANES, _LANES), jnp.float32),
        grid_spec=pltpu.PrefetchScalarGridSpec(
            num_scalar_prefetch=0,
            grid=(2, tiles_per_core),
            in_specs=[
                pl.BlockSpec((tm, _LANES), in_map),
                pl.BlockSpec((tm, _LANES), in_map),
            ],
            out_specs=pl.BlockSpec((1, 4, _SUBLANES, _LANES),
                                   lambda p, i: (p, 0, 0, 0)),
        ),
        compiler_params=pltpu.CompilerParams(
            dimension_semantics=("parallel", "arbitrary"),
            vmem_limit_bytes=32 * 1024 * 1024,
        ),
    )(x2, t2)

    # Tiny final reductions + scalar combine in plain JAX (16 KiB of data).
    totals = jnp.sum(sums, axis=(0, 2, 3))   # (4,)
    sum_pt, sum_p, sum_t, sum_bce = totals[0], totals[1], totals[2], totals[3]

    dice = 1.0 - (2.0 * sum_pt + smooth) / (sum_p + sum_t + smooth)
    bce_mean = sum_bce / jnp.float32(total)
    return d_weight * dice + (1.0 - d_weight) * bce_mean


def _reference(prediction, targets, d_weight=0.5, smooth=1e-8):
    """Pure-JAX reference matching the PyTorch semantics (mean BCE reduction)."""
    x = prediction.astype(jnp.float32)
    t = targets.astype(jnp.float32)
    p = jax.nn.sigmoid(x)
    dice = 1.0 - (2.0 * jnp.sum(p * t) + smooth) / (jnp.sum(p) + jnp.sum(t) + smooth)
    bce = jnp.mean(jnp.maximum(x, 0.0) - x * t + jnp.log1p(jnp.exp(-jnp.abs(x))))
    return d_weight * dice + (1.0 - d_weight) * bce


if __name__ == "__main__":
    key = jax.random.PRNGKey(0)
    k1, k2, k3, k4 = jax.random.split(key, 4)

    # NCHW, like the PyTorch module would receive.
    prediction = jax.random.normal(k1, (2, 4, 16, 16), dtype=jnp.float32)
    targets = (jax.random.uniform(k2, (2, 4, 16, 16)) > 0.5).astype(jnp.float32)
    out = jax.block_until_ready(bce_dice_loss(prediction, targets))
    ref = _reference(prediction, targets)
    assert jnp.allclose(out, ref, rtol=1e-4, atol=1e-4), (out, ref)

    # Ragged size: exercises the in-kernel tail-mask (and small-pad) path.
    pred2 = jax.random.normal(k3, (2, 3, 7, 11), dtype=jnp.float32)
    tgt2 = (jax.random.uniform(k4, (2, 3, 7, 11)) > 0.5).astype(jnp.float32)
    out2 = jax.block_until_ready(bce_dice_loss(pred2, tgt2))
    ref2 = _reference(pred2, tgt2)
    assert jnp.allclose(out2, ref2, rtol=1e-4, atol=1e-4), (out2, ref2)

    print("KERNEL_OK")
</pallas_src>

<mosaic_0001>
module attributes {stable_mosaic.version = 11 : i64} {
  func.func @kernel(%arg0: i32, %arg1: i32, %arg2: memref<16x128xf32, #tpu.memory_space<vmem>>, %arg3: memref<16x128xf32, #tpu.memory_space<vmem>>, %arg4: memref<1x4x8x128xf32, #tpu.memory_space<vmem>>) attributes {dimension_semantics = [#tpu.dimension_semantics<parallel>, #tpu.dimension_semantics<arbitrary>], iteration_bounds = array<i64: 2, 1>, scalar_prefetch = 0 : i64, scratch_operands = 0 : i64, tpu.core_type = #tpu.core_type<tc>, window_params = [{pipeline_mode = #tpu.pipeline_mode<synchronous>, transform_indices = @transform_0, window_bounds = array<i64: 16, 128>}, {pipeline_mode = #tpu.pipeline_mode<synchronous>, transform_indices = @transform_1, window_bounds = array<i64: 16, 128>}, {transform_indices = @transform_2, window_bounds = array<i64: 1, 4, 8, 128>}]} {
    %c1_i32 = arith.constant 1 : i32
    %0 = arith.muli %arg0, %c1_i32 : i32
    %1 = arith.addi %0, %arg1 : i32
    %c0_i32 = arith.constant 0 : i32
    %2 = arith.cmpi eq, %arg1, %c0_i32 : i32
    %3 = arith.extui %2 : i1 to i32
    %c0_i32_0 = arith.constant 0 : i32
    %4 = arith.cmpi ne, %3, %c0_i32_0 : i32
    scf.if %4 {
      %cst = arith.constant 0.000000e+00 : f32
      %8 = vector.broadcast %cst : f32 to vector<1x4x8x128xf32>
      %c0 = arith.constant 0 : index
      %c0_3 = arith.constant 0 : index
      %c0_4 = arith.constant 0 : index
      %c0_5 = arith.constant 0 : index
      %9 = vector.load %arg4[%c0, %c0_3, %c0_4, %c0_5] : memref<1x4x8x128xf32, #tpu.memory_space<vmem>>, vector<1x4x8x128xf32>
      tpu.vector_store %arg4[%c0, %c0_3, %c0_4, %c0_5], %8 {strides = array<i32>} : memref<1x4x8x128xf32, #tpu.memory_space<vmem>>, vector<1x4x8x128xf32>,
    } else {
    }
    %c1_i32_1 = arith.constant 1 : i32
    %5 = arith.cmpi slt, %1, %c1_i32_1 : i32
    %6 = arith.extui %5 : i1 to i32
    %c0_i32_2 = arith.constant 0 : i32
    %7 = arith.cmpi ne, %6, %c0_i32_2 : i32
    scf.if %7 {
      %cst = arith.constant 0.000000e+00 : f32
      %8 = vector.broadcast %cst : f32 to vector<8x128xf32>
      %cst_3 = arith.constant 0.000000e+00 : f32
      %9 = vector.broadcast %cst_3 : f32 to vector<8x128xf32>
      %cst_4 = arith.constant 0.000000e+00 : f32
      %10 = vector.broadcast %cst_4 : f32 to vector<8x128xf32>
      %cst_5 = arith.constant 0.000000e+00 : f32
      %11 = vector.broadcast %cst_5 : f32 to vector<8x128xf32>
      %c0 = arith.constant 0 : index
      %c0_6 = arith.constant 0 : index
      %12 = vector.load %arg2[%c0, %c0_6] : memref<16x128xf32, #tpu.memory_space<vmem>>, vector<16x128xf32>
      %c0_7 = arith.constant 0 : index
      %c0_8 = arith.constant 0 : index
      %13 = vector.load %arg3[%c0_7, %c0_8] : memref<16x128xf32, #tpu.memory_space<vmem>>, vector<16x128xf32>
      %14 = math.absf %12 : vector<16x128xf32>
      %cst_9 = arith.constant 0.000000e+00 : f32
      %15 = vector.broadcast %cst_9 : f32 to vector<16x128xf32>
      %16 = arith.subf %15, %14 : vector<16x128xf32>
      %17 = math.exp %16 : vector<16x128xf32>
      %cst_10 = arith.constant 1.000000e+00 : f32
      %18 = vector.broadcast %cst_10 : f32 to vector<16x128xf32>
      %19 = arith.addf %18, %17 : vector<16x128xf32>
      %20 = tpu.reciprocal %19 {approx = true} : vector<16x128xf32> -> vector<16x128xf32>
      %21 = arith.mulf %19, %20 : vector<16x128xf32>
      %cst_11 = arith.constant 2.000000e+00 : f32
      %22 = vector.broadcast %cst_11 : f32 to vector<16x128xf32>
      %23 = arith.subf %22, %21 : vector<16x128xf32>
      %24 = arith.mulf %20, %23 : vector<16x128xf32>
      %cst_12 = arith.constant 0.000000e+00 : f32
      %25 = vector.broadcast %cst_12 : f32 to vector<16x128xf32>
      %26 = arith.cmpf oge, %12, %25 : vector<16x128xf32>
      %27 = arith.mulf %17, %24 : vector<16x128xf32>
      %28 = arith.select %26, %24, %27 : vector<16x128xi1>, vector<16x128xf32>
      %cst_13 = arith.constant 0.000000e+00 : f32
      %29 = vector.broadcast %cst_13 : f32 to vector<16x128xf32>
      %30 = arith.maximumf %12, %29 : vector<16x128xf32>
      %31 = arith.mulf %12, %13 : vector<16x128xf32>
      %32 = arith.subf %30, %31 : vector<16x128xf32>
      %33 = math.log %19 : vector<16x128xf32>
      %34 = arith.addf %32, %33 : vector<16x128xf32>
      %35 = arith.mulf %28, %13 : vector<16x128xf32>
      %36 = vector.shape_cast %35 : vector<16x128xf32> to vector<2x8x128xf32>
      %cst_14 = arith.constant dense<0.000000e+00> : vector<8x128xf32>
      %37 = vector.multi_reduction <add>, %36, %cst_14 [0] : vector<2x8x128xf32> to vector<8x128xf32>
      %38 = vector.shape_cast %28 : vector<16x128xf32> to vector<2x8x128xf32>
      %cst_15 = arith.constant dense<0.000000e+00> : vector<8x128xf32>
      %39 = vector.multi_reduction <add>, %38, %cst_15 [0] : vector<2x8x128xf32> to vector<8x128xf32>
      %40 = vector.shape_cast %13 : vector<16x128xf32> to vector<2x8x128xf32>
      %cst_16 = arith.constant dense<0.000000e+00> : vector<8x128xf32>
      %41 = vector.multi_reduction <add>, %40, %cst_16 [0] : vector<2x8x128xf32> to vector<8x128xf32>
      %42 = vector.shape_cast %34 : vector<16x128xf32> to vector<2x8x128xf32>
      %cst_17 = arith.constant dense<0.000000e+00> : vector<8x128xf32>
      %43 = vector.multi_reduction <add>, %42, %cst_17 [0] : vector<2x8x128xf32> to vector<8x128xf32>
      %44 = arith.addf %8, %37 : vector<8x128xf32>
      %45 = arith.addf %9, %39 : vector<8x128xf32>
      %46 = arith.addf %10, %41 : vector<8x128xf32>
      %47 = arith.addf %11, %43 : vector<8x128xf32>
      %c0_18 = arith.constant 0 : index
      %c0_19 = arith.constant 0 : index
      %c0_20 = arith.constant 0 : index
      %c0_21 = arith.constant 0 : index
      %48 = vector.load %arg4[%c0_18, %c0_19, %c0_20, %c0_21] : memref<1x4x8x128xf32, #tpu.memory_space<vmem>>, vector<1x1x8x128xf32>
      %49 = vector.shape_cast %48 : vector<1x1x8x128xf32> to vector<8x128xf32>
      %50 = arith.addf %49, %44 : vector<8x128xf32>
      %c0_22 = arith.constant 0 : index
      %c0_23 = arith.constant 0 : index
      %c0_24 = arith.constant 0 : index
      %c0_25 = arith.constant 0 : index
      %51 = vector.load %arg4[%c0_22, %c0_23, %c0_24, %c0_25] : memref<1x4x8x128xf32, #tpu.memory_space<vmem>>, vector<1x1x8x128xf32>
      %52 = vector.shape_cast %51 : vector<1x1x8x128xf32> to vector<8x128xf32>
      %53 = vector.shape_cast %50 : vector<8x128xf32> to vector<1x1x8x128xf32>
      tpu.vector_store %arg4[%c0_22, %c0_23, %c0_24, %c0_25], %53 {strides = array<i32>} : memref<1x4x8x128xf32, #tpu.memory_space<vmem>>, vector<1x1x8x128xf32>,
      %c0_26 = arith.constant 0 : index
      %c1 = arith.constant 1 : index
      %c0_27 = arith.constant 0 : index
      %c0_28 = arith.constant 0 : index
      %54 = vector.load %arg4[%c0_26, %c1, %c0_27, %c0_28] : memref<1x4x8x128xf32, #tpu.memory_space<vmem>>, vector<1x1x8x128xf32>
      %55 = vector.shape_cast %54 : vector<1x1x8x128xf32> to vector<8x128xf32>
      %56 = arith.addf %55, %45 : vector<8x128xf32>
      %c0_29 = arith.constant 0 : index
      %c1_30 = arith.constant 1 : index
      %c0_31 = arith.constant 0 : index
      %c0_32 = arith.constant 0 : index
      %57 = vector.load %arg4[%c0_29, %c1_30, %c0_31, %c0_32] : memref<1x4x8x128xf32, #tpu.memory_space<vmem>>, vector<1x1x8x128xf32>
      %58 = vector.shape_cast %57 : vector<1x1x8x128xf32> to vector<8x128xf32>
      %59 = vector.shape_cast %56 : vector<8x128xf32> to vector<1x1x8x128xf32>
      tpu.vector_store %arg4[%c0_29, %c1_30, %c0_31, %c0_32], %59 {strides = array<i32>} : memref<1x4x8x128xf32, #tpu.memory_space<vmem>>, vector<1x1x8x128xf32>,
      %c0_33 = arith.constant 0 : index
      %c2 = arith.constant 2 : index
      %c0_34 = arith.constant 0 : index
      %c0_35 = arith.constant 0 : index
      %60 = vector.load %arg4[%c0_33, %c2, %c0_34, %c0_35] : memref<1x4x8x128xf32, #tpu.memory_space<vmem>>, vector<1x1x8x128xf32>
      %61 = vector.shape_cast %60 : vector<1x1x8x128xf32> to vector<8x128xf32>
      %62 = arith.addf %61, %46 : vector<8x128xf32>
      %c0_36 = arith.constant 0 : index
      %c2_37 = arith.constant 2 : index
      %c0_38 = arith.constant 0 : index
      %c0_39 = arith.constant 0 : index
      %63 = vector.load %arg4[%c0_36, %c2_37, %c0_38, %c0_39] : memref<1x4x8x128xf32, #tpu.memory_space<vmem>>, vector<1x1x8x128xf32>
      %64 = vector.shape_cast %63 : vector<1x1x8x128xf32> to vector<8x128xf32>
      %65 = vector.shape_cast %62 : vector<8x128xf32> to vector<1x1x8x128xf32>
      tpu.vector_store %arg4[%c0_36, %c2_37, %c0_38, %c0_39], %65 {strides = array<i32>} : memref<1x4x8x128xf32, #tpu.memory_space<vmem>>, vector<1x1x8x128xf32>,
      %c0_40 = arith.constant 0 : index
      %c3 = arith.constant 3 : index
      %c0_41 = arith.constant 0 : index
      %c0_42 = arith.constant 0 : index
      %66 = vector.load %arg4[%c0_40, %c3, %c0_41, %c0_42] : memref<1x4x8x128xf32, #tpu.memory_space<vmem>>, vector<1x1x8x128xf32>
      %67 = vector.shape_cast %66 : vector<1x1x8x128xf32> to vector<8x128xf32>
      %68 = arith.addf %67, %47 : vector<8x128xf32>
      %c0_43 = arith.constant 0 : index
      %c3_44 = arith.constant 3 : index
      %c0_45 = arith.constant 0 : index
      %c0_46 = arith.constant 0 : index
      %69 = vector.load %arg4[%c0_43, %c3_44, %c0_45, %c0_46] : memref<1x4x8x128xf32, #tpu.memory_space<vmem>>, vector<1x1x8x128xf32>
      %70 = vector.shape_cast %69 : vector<1x1x8x128xf32> to vector<8x128xf32>
      %71 = vector.shape_cast %68 : vector<8x128xf32> to vector<1x1x8x128xf32>
      tpu.vector_store %arg4[%c0_43, %c3_44, %c0_45, %c0_46], %71 {strides = array<i32>} : memref<1x4x8x128xf32, #tpu.memory_space<vmem>>, vector<1x1x8x128xf32>,
    } else {
    }
    return
  }
  func.func @transform_0(%arg0: i32, %arg1: i32) -> (i32, i32) {
    %c0_i32 = arith.constant 0 : i32
    %c0_i32_0 = arith.constant 0 : i32
    %c0_i32_1 = arith.constant 0 : i32
    return %c0_i32, %c0_i32_0 : i32, i32
  }
  func.func @transform_1(%arg0: i32, %arg1: i32) -> (i32, i32) {
    %c0_i32 = arith.constant 0 : i32
    %c0_i32_0 = arith.constant 0 : i32
    %c0_i32_1 = arith.constant 0 : i32
    return %c0_i32, %c0_i32_0 : i32, i32
  }
  func.func @transform_2(%arg0: i32, %arg1: i32) -> (i32, i32, i32, i32) {
    %c0_i32 = arith.constant 0 : i32
    %c0_i32_0 = arith.constant 0 : i32
    %c0_i32_1 = arith.constant 0 : i32
    %c0_i32_2 = arith.constant 0 : i32
    return %arg0, %c0_i32, %c0_i32_0, %c0_i32_1 : i32, i32, i32, i32
  }
}

</mosaic_0001>

<bundles_post_ra>
// kernel: tpu_custom_call.1
= control target key start
LH: loop header
LB: loop body
LE: loop exit
PB: predicated region body
PF: predicated region fallthrough
CT: control target
= control target key end

     0   :  { %7 = vsyncpa [#allocation3], 0  ;;  %s767_s0 = inlined_call_operand.hbm [shape: f32[16,128], index: 0, kind: input, shape index: {}]   ;;  %s768_s1 = inlined_call_operand.hbm [shape: f32[16,128], index: 1, kind: input, shape index: {}]   ;;  %s769_s2 = inlined_call_operand.hbm [shape: f32[2,4,8,128], index: 2, kind: output, shape index: {}]  }
   0x1   :  { %8 = vsyncpa [#allocation6], 0 }
   0x2   :  { %9 = vsyncpa [#allocation4], 0 }
   0x3   :  { %11 = vsyncpa [#allocation4 + $0x1], 0  ;;  %s627_s9 = smov 0   ;;  %s629_s10 = smov 0  }
   0x4   :  { %s631_s11 = smov 0   ;;  %s633_s12 = smov 0  }
   0x5   :  { %s635_s13 = smov 0   ;;  %s637_s14 = smov 0  }
   0x6 LB: > { %s342_s15 = sadd.s32 4294967295, %s603_s14   ;;  %s343_s16 = sadd.s32 4294967294, %s603_s14   ;;  %s603_s14 = sphi %s637_s14, %s17_s14   ;;  %s599_s13 = sphi %s635_s13, %s778_s13   ;;  %s595_s12 = sphi %s633_s12, %s777_s12   ;;  %s591_s11 = sphi %s631_s11, %s776_s11   ;;  %s587_s10 = sphi %s629_s10, %s775_s10   ;;  %s583_s9 = sphi %s627_s9, %s774_s9  }
   0x7   : > { %s29_s17 = sadd.s32 1, %s599_s13  ;;  %s78_s18 = sadd.s32 1, %s591_s11 }
   0x8   : > { %p31_p0 = scmp.ge.s32.totalorder %s29_s17, 2  ;;  %p88_p1 = scmp.ne.s32.totalorder %s591_s11, %s587_s10 }
   0x9   : > { %p89_p2 = scmp.eq.s32.totalorder %s342_s15, 1  ;;  %p94_p3 = scmp.ne.s32.totalorder %s587_s10, %s583_s9 }
   0xa   : > { %s780_s17 = smov (%p31_p0, %s29_s17), 0  ;;  %p95_p5 = scmp.eq.s32.totalorder %s343_s16, 1 }
   0xb   : > { %p667_p4 = por %p89_p2, %p88_p1  ;;  %s75_s20 = ssub.s32 %s599_s13, %s780_s17 }
   0xc   : > { %p344_p6 = scmp.ge.s32.totalorder %s603_s14, 1  ;;  %p76_p7 = scmp.eq.s32.totalorder %s75_s20, 0 }
   0xd   : > { %p674_p8 = por %p95_p5, %p94_p3  ;;  %p102_p9 = scmp.lt.s32.totalorder %s603_s14, 3 }
   0xe   : > { %s680_s22 = scalar_select %p76_p7, %s591_s11, %s78_s18  }
   0xf   : > { %p682_p10 = pnand %p344_p6, %p102_p9  ;;  %p686_p11 = scmp.eq.s32.totalorder %s342_s15, 0 }
  0x10   : > { %s113_s27 = sshll.u32 %s767_s0, 4  ;;  %s605_s28 = smov [#allocation2]   ;;  %s114_s27 = int_to_ptr.hbm [resolvable:$true] %s113_s27 }
  0x11   : > { %p374_p12 = pneg %p682_p10  ;;  %s115_s29 = sshll.u32 %s605_s28, 4  ;;  %s116_s29 = int_to_ptr.vmem [resolvable:$true] %s115_s29 }
  0x12   : > { %s127_s4 = sshll.u32 %s768_s1, 4  ;;  %s606_s5 = smov 128   ;;  %s128_s4 = int_to_ptr.hbm [resolvable:$true] %s127_s4 }
  0x13   : > { %p375_p13 = pnand %p686_p11, %p374_p12  ;;  %s607_s6 = smov 8  }
  0x14   : > { %s608_s7 = smov [#allocation5]   ;;  %145 = sbr.rel (%p682_p10) target bundleno = 91 (0x5b), region = 28 }
  0x15   : > { %377 = dma.hbm_to_vmem [thread:$0]  (!%p375_p13), %s114_s27, 256, %s116_s29, [#allocation3], %s606_s5, %s606_s5, %s607_s6  }
  0x16   : > { %s129_s8 = sshll.u32 %s608_s7, 4  ;;  %s130_s8 = int_to_ptr.vmem [resolvable:$true] %s129_s8 }
  0x17   : > { %380 = dma.hbm_to_vmem [thread:$0]  (!%p375_p13), %s128_s4, 256, %s130_s8, [#allocation6], %s606_s5, %s606_s5, %s607_s6  }
  0x19   : > { %570 = dma.done.wait (%p686_p11), [#allocation3], 256  }
  0x1a   : > { %572 = vsyncadd (%p686_p11), [#allocation3], 4294967040 }
  0x1b   : > { %574 = dma.done.wait (%p686_p11), [#allocation6], 256  }
  0x1c   : > { %576 = vsyncadd (%p686_p11), [#allocation6], 4294967040  ;;  %s165_s15 = sand.u32 1, %s587_s10   ;;  %v609_v0 = vmov 0.0   ;;  %p351_p0 = scmp.ge.s32.totalorder %s595_s12, 1 }
  0x1d   : > { %s350_s16 = sshll.u32 %s165_s15, 5 }
  0x1e   : > { %s713_s18 = scalar_lea.vmem [#allocation7], %s350_s16  ;;  %180 = sbr.rel (%p351_p0) target bundleno = 75 (0x4b), region = 44 }
  0x1f   : > { %173 = vst [vmem:[%s713_s18] sm:$0xff] %v609_v0 }
  0x20   : > { %174 = vst [vmem:[%s713_s18 + $0x8] sm:$0xff] %v609_v0 }
  0x21   : > { %175 = vst [vmem:[%s713_s18 + $0x10] sm:$0xff] %v609_v0 }
  0x22   : > { %176 = vst [vmem:[%s713_s18 + $0x18] sm:$0xff] %v609_v0 }
  0x23   : > { %v181_v1 = vld [vmem:[#allocation2] sm:$0xff]  ;;  %v182_v2 = vld [vmem:[#allocation2 + $0x8] sm:$0xff]  ;;  %v183_v5 = vld [vmem:[#allocation5] sm:$0xff] }
  0x24   : > { %v185_v3 = vand.u32 2147483647, %v181_v1  ;;  %v186_v4 = vand.u32 2147483647, %v182_v2  ;;  %v184_v6 = vld [vmem:[#allocation5 + $0x8] sm:$0xff]  ;;  %v209_v18 = vmax.f32 %v181_v1, 0.0  ;;  %v211_v19 = vmul.f32 %v183_v5, %v181_v1 }
  0x25   : > { %v225_v9 = vadd.f32 %v184_v6, %v183_v5  ;;  %v210_v20 = vmax.f32 %v182_v2, 0.0  ;;  %v212_v21 = vmul.f32 %v184_v6, %v182_v2  ;;  %vm203_vm0 = vcmp.ge.f32.partialorder %v181_v1, 0.0 }
  0x26   : > { %v187_v7 = vsub.f32 0.0, %v185_v3  ;;  %v188_v8 = vsub.f32 0.0, %v186_v4  ;;  %v213_v25 = vsub.f32 %v209_v18, %v211_v19  ;;  %vm204_vm1 = vcmp.ge.f32.partialorder %v182_v2, 0.0  ;;  %v231_v49 = vld [vmem:[%s713_s18] sm:$0xff] }
  0x27   : > { %v214_v28 = vsub.f32 %v210_v20, %v212_v21  ;;  %v352_v45 = vld [vmem:[%s713_s18 + $0x8] sm:$0xff] }
  0x28   : > { %v354_v10 = vld [vmem:[%s713_s18 + $0x10] sm:$0xff]  ;;  %v189_v11 = vmul.f32 1.442695, %v187_v7  ;;  %v191_v12 = vmul.f32 1.442695, %v188_v8 }
  0x29   : > { %v240_v13 = vadd.f32 %v354_v10, %v225_v9  ;;  %v356_v39 = vld [vmem:[%s713_s18 + $0x18] sm:$0xff] }
  0x2a   : > { %445 = vpow2.f32 %v189_v11 }
  0x2b   : > { %355 = vst [vmem:[%s713_s18 + $0x10] sm:$0xff] %v240_v13  ;;  %447 = vpow2.f32 %v191_v12 }
  0x30   : > { %v446_v14 = vpop.eup %445 }
  0x31   : > { %v448_v15 = vpop.eup %447  ;;  %v193_v16 = vadd.f32 1.0, %v446_v14 }
  0x32   : > { %v194_v17 = vadd.f32 1.0, %v448_v15 }
  0x33   : > { %449 = vrcp.f32 %v193_v16 }
  0x34   : > { %451 = vrcp.f32 %v194_v17 }
  0x35   : > { %453 = vlog2.f32 %v193_v16 }
  0x36   : > { %455 = vlog2.f32 %v194_v17 }
  0x39   : > { %v450_v22 = vpop.eup %449 }
  0x3a   : > { %v452_v23 = vpop.eup %451  ;;  %v197_v24 = vmul.f32 %v450_v22, %v193_v16 }
  0x3b   : > { %v454_v26 = vpop.eup %453  ;;  %v198_v27 = vmul.f32 %v452_v23, %v194_v17 }
  0x3c   : > { %v456_v29 = vpop.eup %455  ;;  %v199_v30 = vsub.f32 2.0, %v197_v24  ;;  %v216_v31 = vmul.f32 0.6931472, %v454_v26 }
  0x3d   : > { %v200_v32 = vsub.f32 2.0, %v198_v27  ;;  %v218_v33 = vmul.f32 0.6931472, %v456_v29 }
  0x3e   : > { %v201_v34 = vmul.f32 %v450_v22, %v199_v30  ;;  %v219_v35 = vadd.f32 %v216_v31, %v213_v25 }
  0x3f   : > { %v202_v36 = vmul.f32 %v452_v23, %v200_v32  ;;  %v220_v37 = vadd.f32 %v218_v33, %v214_v28 }
  0x40   : > { %v205_v38 = vmul.f32 %v446_v14, %v201_v34 }
  0x41   : > { %v206_v40 = vmul.f32 %v448_v15, %v202_v36  ;;  %v226_v41 = vadd.f32 %v220_v37, %v219_v35 }
  0x42   : > { %v207_v42 = vsel %vm203_vm0, %v201_v34, %v205_v38 }
  0x43   : > { %v208_v43 = vsel %vm204_vm1, %v202_v36, %v206_v40  ;;  %v221_v44 = vmul.f32 %v207_v42, %v183_v5  ;;  %v244_v46 = vadd.f32 %v356_v39, %v226_v41 }
  0x44   : > { %v222_v47 = vmul.f32 %v208_v43, %v184_v6  ;;  %v224_v48 = vadd.f32 %v208_v43, %v207_v42 }
  0x45   : > { %357 = vst [vmem:[%s713_s18 + $0x18] sm:$0xff] %v244_v46 }
  0x46   : > { %v223_v50 = vadd.f32 %v222_v47, %v221_v44  ;;  %v236_v51 = vadd.f32 %v352_v45, %v224_v48 }
  0x48   : > { %v232_v52 = vadd.f32 %v231_v49, %v223_v50  ;;  %353 = vst [vmem:[%s713_s18 + $0x8] sm:$0xff] %v236_v51 }
  0x4a   : > { %233 = vst [vmem:[%s713_s18] sm:$0xff] %v232_v52 }
  0x4b PF: > { %s363_s20 = sshll.u32 %s595_s12, 5  ;;  %s259_s26 = sshll.u32 %s713_s18, 4  ;;  %s260_s26 = int_to_ptr.vmem [resolvable:$true] %s259_s26 }
  0x4c   : > { %s258_s25 = scalar_lea.hbm %s769_s2, %s363_s20  ;;  %s247_s28 = scalar_lea.sflag [#allocation4], %s165_s15 }
  0x4d   : > { %s261_s27 = sshll.u32 %s258_s25, 4  ;;  %s537_s12 = scalar_lea.hbm %s769_s2, 64  ;;  %s262_s27 = int_to_ptr.hbm [resolvable:$true] %s261_s27 }
  0x4e   : > { %s531_s29 = sshra.s32 %s262_s27, 4  ;;  %s532_s29 = int_to_ptr.hbm [resolvable:$true] %s531_s29 }
  0x4f   : > { %s533_s30 = scalar_lea.hbm %s532_s29, 32  ;;  %p538_p5 = scmp.lt.s32.totalorder %s532_s29, %s769_s2 }
  0x50   : > { %p534_p1 = scmp.ne.s32.totalorder %s532_s29, %s533_s30  ;;  %p539_p6 = scmp.lt.s32.totalorder %s537_s12, %s533_s30 }
  0x52   : > { %p535_p2 = pnand %p534_p1, %p667_p4  ;;  %p540_p7 = por %p539_p6, %p538_p5 }
  0x54   : > { %p536_p3 = pneg %p535_p2 }
  0x56   : > { %p541_p9 = pnand %p540_p7, %p536_p3 }
  0x58   : > { %544 = shalt.err (!%p541_p9)
}
  0x59   : > { %s610_s7 = smov 128   ;;  %s611_s8 = smov 8  }
  0x5a   : > { %372 = dma.vmem_to_hbm [thread:$0]  (%p667_p4), %s260_s26, 512, %s262_s27, %s247_s28, %s610_s7, %s610_s7, %s611_s8  }
  0x5b PF: > { %p389_p10 = scmp.ge.s32.totalorder %s603_s14, 2  ;;  %s276_s15 = sand.u32 1, %s583_s9  }
  0x5c   : > { %s277_s16 = scalar_lea.sflag [#allocation4], %s276_s15 }
  0x5d   : > { %p382_p11 = pnand %p389_p10, %p674_p8 }
  0x5f   : > { %p383_p12 = pneg %p382_p11 }
  0x61   : > { %578 = dma.done.wait (%p383_p12), %s277_s16, 512  }
  0x62   : > { %580 = vsyncadd (%p383_p12), %s277_s16, 4294966784  ;;  %s17_s14 = sadd.s32 1, %s603_s14   ;;  %s774_s9 = smov %s587_s10 }
  0x63   : > { %p14_p13 = scmp.ge.s32.totalorder %s17_s14, 4   ;;  %s775_s10 = smov %s591_s11 }
  0x64   : > { %s776_s11 = smov %s680_s22  ;;  %s777_s12 = smov %s599_s13 }
  0x65   : > { %s778_s13 = smov %s780_s17  ;;  %16 = sbr.rel (!%p14_p13) target bundleno = 6 (0x6), region = 80 }
  0x6a   :  { %283 = vsyncpa [#allocation3], 1 }
  0x6b   :  { %285 = vsyncpa [#allocation3 + $0x1], 1 }
  0x6c   :  { %286 = vsyncpa [#allocation6], 1 }
  0x6d   :  { %287 = vsyncpa [#allocation4], 1 }
  0x6e   :  { %289 = vsyncpa [#allocation4 + $0x1], 1 }

</bundles_post_ra>
